<compile_context>
chip_gen: v6e
topology: v6e:2x2x1
jax: 0.10.0
libtpu: 0.0.40
codegen_flags: <defaults>
</compile_context>

<pallas_src>
import math
import functools

import jax
import jax.numpy as jnp
from jax import lax
from jax.experimental import pallas as pl
from jax.experimental.pallas import tpu as pltpu


_VMEM_LIMIT = 48 * 1024 * 1024  # under v7x's 64 MiB, above 16/32 MiB defaults


def _fit_tile(dim, pref, unit):
    """Largest tile <= pref that divides dim and is a multiple of `unit`;
    falls back to the full dim (full-extent blocks are always legal)."""
    if dim <= pref:
        return dim
    t = (pref // unit) * unit
    while t >= unit:
        if dim % t == 0:
            return t
        t -= unit
    return dim


# ----------------------------- Linear (tiled) -------------------------------

def _make_linear_kernel(activation, has_residual):
    def kernel(*refs):
        if has_residual:
            x_ref, w_ref, b_ref, r_ref, o_ref, acc_ref = refs
        else:
            x_ref, w_ref, b_ref, o_ref, acc_ref = refs
            r_ref = None

        k = pl.program_id(2)

        @pl.when(k == 0)
        def _():
            acc_ref[...] = jnp.zeros_like(acc_ref)

        acc_ref[...] += jnp.dot(
            x_ref[...], w_ref[...], preferred_element_type=jnp.float32
        )

        @pl.when(k == pl.num_programs(2) - 1)
        def _():
            y = acc_ref[...] + b_ref[...]          # bias only at finalize
            if activation == "relu":
                y = jnp.maximum(y, 0.0)
            if r_ref is not None:                  # fused residual add
                y = y + r_ref[...]
            o_ref[...] = y.astype(o_ref.dtype)

    return kernel


def linear(x, w, b, *, residual=None, activation=None,
           compute_dtype=jnp.float32, tm_pref=256, tn_pref=512, tk_pref=512):
    """y = x @ w + b [, relu][, + residual].

    x: (M, K) -- w: (K, N) pre-transposed weights -- b: (N,).
    MXU operands are cast to `compute_dtype` (use bf16 on v6e/v7x); the
    accumulator, bias and residual stay float32.
    """
    m, k_dim = x.shape
    _, n = w.shape
    tm = _fit_tile(m, tm_pref, 8)
    tn = _fit_tile(n, tn_pref, 128)
    tk = _fit_tile(k_dim, tk_pref, 128)
    grid = (m // tm, n // tn, k_dim // tk)

    in_specs = [
        pl.BlockSpec((tm, tk), lambda i, j, k: (i, k)),
        pl.BlockSpec((tk, tn), lambda i, j, k: (k, j)),
        pl.BlockSpec((1, tn), lambda i, j, k: (0, j)),
    ]
    args = [x.astype(compute_dtype), w.astype(compute_dtype), b.reshape(1, n)]
    if residual is not None:
        in_specs.append(pl.BlockSpec((tm, tn), lambda i, j, k: (i, j)))
        args.append(residual)

    return pl.pallas_call(
        _make_linear_kernel(activation, residual is not None),
        out_shape=jax.ShapeDtypeStruct((m, n), jnp.float32),
        grid=grid,
        in_specs=in_specs,
        out_specs=pl.BlockSpec((tm, tn), lambda i, j, k: (i, j)),
        scratch_shapes=[pltpu.VMEM((tm, tn), jnp.float32)],
        compiler_params=pltpu.CompilerParams(
            dimension_semantics=("parallel", "parallel", "arbitrary"),
            vmem_limit_bytes=_VMEM_LIMIT,
        ),
    )(*args)


# --------------------------------- LayerNorm --------------------------------

def _layernorm_kernel(x_ref, a_ref, b_ref, o_ref, *, eps):
    x = x_ref[...]
    d = x.shape[-1]
    mean = jnp.mean(x, axis=-1, keepdims=True)
    xc = x - mean
    # torch.std(-1) is the unbiased estimator (n - 1 denominator).
    var = jnp.sum(xc * xc, axis=-1, keepdims=True) * (1.0 / (d - 1))
    std = jnp.sqrt(var)
    o_ref[...] = a_ref[...] * xc / (std + eps) + b_ref[...]


def layernorm(x2d, a, b, *, eps=1e-6, tm_pref=256):
    m, d = x2d.shape
    tm = _fit_tile(m, tm_pref, 8)
    return pl.pallas_call(
        functools.partial(_layernorm_kernel, eps=eps),
        out_shape=jax.ShapeDtypeStruct((m, d), jnp.float32),
        grid=(m // tm,),
        in_specs=[
            pl.BlockSpec((tm, d), lambda i: (i, 0)),
            pl.BlockSpec((1, d), lambda i: (0, 0)),
            pl.BlockSpec((1, d), lambda i: (0, 0)),
        ],
        out_specs=pl.BlockSpec((tm, d), lambda i: (i, 0)),
        compiler_params=pltpu.CompilerParams(
            dimension_semantics=("parallel",)),
    )(x2d, a.reshape(1, d), b.reshape(1, d))


# ------------------------------ Self-attention -------------------------------

def _make_attention_kernel(h, d_k, scale):
    d_model = h * d_k

    def kernel(qkv_ref, mask_ref, o_ref):
        # One batch row per grid step; all heads handled here so the output
        # block is the full lane-dense (S, d_model) row (no head transposes).
        qkv = qkv_ref[...]          # (S, 3*d_model), compute dtype
        mask = mask_ref[...]        # (1, S) -- broadcast over query positions
        outs = []
        for i in range(h):
            q = qkv[:, i * d_k:(i + 1) * d_k]
            k = qkv[:, d_model + i * d_k:d_model + (i + 1) * d_k]
            v = qkv[:, 2 * d_model + i * d_k:2 * d_model + (i + 1) * d_k]
            # Contract last dims directly -- no explicit K transpose.
            scores = lax.dot_general(
                q, k, (((1,), (1,)), ((), ())),
                preferred_element_type=jnp.float32) * scale
            scores = jnp.where(mask > 0, scores, jnp.float32(-1e9))
            m = jnp.max(scores, axis=-1, keepdims=True)
            e = jnp.exp(scores - m)
            denom = jnp.sum(e, axis=-1, keepdims=True)
            p = e * pl.reciprocal(denom, approx=True)   # EUP, frees VPU slots
            outs.append(jnp.dot(p.astype(v.dtype), v,
                                preferred_element_type=jnp.float32))
        o_ref[...] = jnp.concatenate(outs, axis=-1).astype(o_ref.dtype)

    return kernel


def self_attention(qkv, mask, h, *, compute_dtype=jnp.float32):
    """qkv: (B, S, 3*d_model) fused projections, mask: (B, 1, S) 1/0 floats."""
    b, s, three_d = qkv.shape
    d_model = three_d // 3
    d_k = d_model // h
    kernel = _make_attention_kernel(h, d_k, 1.0 / math.sqrt(d_k))
    return pl.pallas_call(
        kernel,
        out_shape=jax.ShapeDtypeStruct((b, s, d_model), jnp.float32),
        grid=(b,),
        in_specs=[
            pl.BlockSpec((None, s, three_d), lambda i: (i, 0, 0)),
            pl.BlockSpec((None, 1, s), lambda i: (i, 0, 0)),
        ],
        out_specs=pl.BlockSpec((None, s, d_model), lambda i: (i, 0, 0)),
        compiler_params=pltpu.CompilerParams(
            dimension_semantics=("parallel",),
            vmem_limit_bytes=_VMEM_LIMIT,
        ),
    )(qkv.astype(compute_dtype), mask)


# ----------------------------- EncoderLayer forward --------------------------

def init_encoder_layer_params(key, h, d_model, d_ff):
    """Weights stored pre-transposed as (d_in, d_out); PyTorch-style bounds."""
    def uniform(k, shape, fan_in):
        bound = 1.0 / math.sqrt(fan_in)
        return jax.random.uniform(k, shape, jnp.float32, -bound, bound)

    ks = jax.random.split(key, 12)
    return {
        "h": h, "d_model": d_model, "d_ff": d_ff,
        # fused Q/K/V projection + output projection
        "w_qkv": uniform(ks[0], (d_model, 3 * d_model), d_model),
        "b_qkv": uniform(ks[1], (3 * d_model,), d_model),
        "w_o": uniform(ks[2], (d_model, d_model), d_model),
        "b_o": uniform(ks[3], (d_model,), d_model),
        # position-wise feed-forward
        "w_ff1": uniform(ks[4], (d_model, d_ff), d_model),
        "b_ff1": uniform(ks[5], (d_ff,), d_model),
        "w_ff2": uniform(ks[6], (d_ff, d_model), d_ff),
        "b_ff2": uniform(ks[7], (d_model,), d_ff),
        # two LayerNorms (perturbed so scale/shift are exercised)
        "ln1_a": 1.0 + 0.1 * jax.random.normal(ks[8], (d_model,), jnp.float32),
        "ln1_b": 0.1 * jax.random.normal(ks[9], (d_model,), jnp.float32),
        "ln2_a": 1.0 + 0.1 * jax.random.normal(ks[10], (d_model,), jnp.float32),
        "ln2_b": 0.1 * jax.random.normal(ks[11], (d_model,), jnp.float32),
    }


def encoder_layer(params, x, mask, *, compute_dtype=jnp.float32):
    """EncoderLayer.forward (eval mode: dropout = identity)."""
    b, s, d_model = x.shape
    h = params["h"]
    x2d = x.reshape(b * s, d_model)

    # --- sublayer 0: x + self_attn(LayerNorm(x), mask) ---
    xn = layernorm(x2d, params["ln1_a"], params["ln1_b"])
    qkv = linear(xn, params["w_qkv"], params["b_qkv"],
                 compute_dtype=compute_dtype)                       # fused QKV
    attn = self_attention(qkv.reshape(b, s, 3 * d_model), mask, h,
                          compute_dtype=compute_dtype)
    x2d = linear(attn.reshape(b * s, d_model), params["w_o"], params["b_o"],
                 residual=x2d, compute_dtype=compute_dtype)         # + residual

    # --- sublayer 1: x + FFN(LayerNorm(x)) ---
    xn = layernorm(x2d, params["ln2_a"], params["ln2_b"])
    hidden = linear(xn, params["w_ff1"], params["b_ff1"],
                    activation="relu", compute_dtype=compute_dtype)
    x2d = linear(hidden, params["w_ff2"], params["b_ff2"],
                 residual=x2d, compute_dtype=compute_dtype)         # + residual
    return x2d.reshape(b, s, d_model)


# ----------------------------- Pure-JAX reference ----------------------------

def reference_encoder_layer(params, x, mask, eps=1e-6):
    h = params["h"]
    b, s, d_model = x.shape
    d_k = d_model // h

    def ln(y, a, bb):
        mean = y.mean(-1, keepdims=True)
        std = jnp.std(y, axis=-1, ddof=1, keepdims=True)
        return a * (y - mean) / (std + eps) + bb

    # sublayer 0
    xn = ln(x, params["ln1_a"], params["ln1_b"])
    qkv = xn @ params["w_qkv"] + params["b_qkv"]
    q, k, v = jnp.split(qkv, 3, axis=-1)

    def heads(t):
        return t.reshape(b, s, h, d_k).transpose(0, 2, 1, 3)

    q, k, v = heads(q), heads(k), heads(v)
    scores = jnp.einsum("bhqd,bhkd->bhqk", q, k) / math.sqrt(d_k)
    scores = jnp.where(mask[:, None, :, :] > 0, scores, -1e9)
    p = jax.nn.softmax(scores, axis=-1)
    attn = jnp.einsum("bhqk,bhkd->bhqd", p, v)
    attn = attn.transpose(0, 2, 1, 3).reshape(b, s, d_model)
    x = x + attn @ params["w_o"] + params["b_o"]

    # sublayer 1
    xn = ln(x, params["ln2_a"], params["ln2_b"])
    ff = jnp.maximum(xn @ params["w_ff1"] + params["b_ff1"], 0.0)
    ff = ff @ params["w_ff2"] + params["b_ff2"]
    return x + ff


# ------------------------------------ Main ------------------------------------

if __name__ == "__main__":
    batch, seq, d_model, h, d_ff = 2, 8, 32, 4, 128

    root = jax.random.PRNGKey(0)
    kx, kp = jax.random.split(root, 2)
    x = jax.random.normal(kx, (batch, seq, d_model), jnp.float32)

    # Encoder (padding) mask: (B, 1, S), 1 = attend, 0 = masked key.
    mask = jnp.ones((batch, 1, seq), jnp.float32)
    mask = mask.at[1, 0, seq - 2:].set(0.0)

    params = init_encoder_layer_params(kp, h, d_model, d_ff)

    out = encoder_layer(params, x, mask)          # f32 demo; bf16 on v6e/v7x
    out = jax.block_until_ready(out)

    ref = reference_encoder_layer(params, x, mask)
    assert out.shape == (batch, seq, d_model)
    max_err = float(jnp.max(jnp.abs(out - ref)))
    # Tolerance covers the approximate (EUP) softmax reciprocal.
    assert max_err < 2e-2, f"mismatch vs reference: max abs err {max_err}"

    print("KERNEL_OK")
</pallas_src>

<mosaic_0001>
module attributes {stable_mosaic.version = 11 : i64} {
  func.func @_layernorm_kernel(%arg0: i32, %arg1: memref<16x32xf32, #tpu.memory_space<vmem>>, %arg2: memref<1x32xf32, #tpu.memory_space<vmem>>, %arg3: memref<1x32xf32, #tpu.memory_space<vmem>>, %arg4: memref<16x32xf32, #tpu.memory_space<vmem>>) attributes {dimension_semantics = [#tpu.dimension_semantics<parallel>], iteration_bounds = array<i64: 1>, scalar_prefetch = 0 : i64, scratch_operands = 0 : i64, tpu.core_type = #tpu.core_type<tc>, window_params = [{transform_indices = @transform_0, window_bounds = array<i64: 16, 32>}, {pipeline_mode = #tpu.pipeline_mode<synchronous>, transform_indices = @transform_1, window_bounds = array<i64: 1, 32>}, {pipeline_mode = #tpu.pipeline_mode<synchronous>, transform_indices = @transform_2, window_bounds = array<i64: 1, 32>}, {transform_indices = @transform_3, window_bounds = array<i64: 16, 32>}]} {
    %c0 = arith.constant 0 : index
    %c0_0 = arith.constant 0 : index
    %0 = vector.load %arg1[%c0, %c0_0] : memref<16x32xf32, #tpu.memory_space<vmem>>, vector<16x32xf32>
    %cst = arith.constant dense<0.000000e+00> : vector<16xf32>
    %1 = vector.multi_reduction <add>, %0, %cst [1] : vector<16x32xf32> to vector<16xf32>
    %2 = vector.shape_cast %1 : vector<16xf32> to vector<16x1xf32>
    %cst_1 = arith.constant 3.200000e+01 : f32
    %3 = vector.broadcast %cst_1 : f32 to vector<16x1xf32>
    %4 = arith.divf %2, %3 : vector<16x1xf32>
    %5 = vector.broadcast %4 : vector<16x1xf32> to vector<16x32xf32>
    %6 = arith.subf %0, %5 : vector<16x32xf32>
    %7 = arith.mulf %6, %6 : vector<16x32xf32>
    %cst_2 = arith.constant dense<0.000000e+00> : vector<16xf32>
    %8 = vector.multi_reduction <add>, %7, %cst_2 [1] : vector<16x32xf32> to vector<16xf32>
    %9 = vector.shape_cast %8 : vector<16xf32> to vector<16x1xf32>
    %cst_3 = arith.constant 0.0322580636 : f32
    %10 = vector.broadcast %cst_3 : f32 to vector<16x1xf32>
    %11 = arith.mulf %9, %10 : vector<16x1xf32>
    %12 = math.sqrt %11 : vector<16x1xf32>
    %c0_4 = arith.constant 0 : index
    %c0_5 = arith.constant 0 : index
    %13 = vector.load %arg2[%c0_4, %c0_5] : memref<1x32xf32, #tpu.memory_space<vmem>>, vector<1x32xf32>
    %14 = vector.broadcast %13 : vector<1x32xf32> to vector<16x32xf32>
    %15 = arith.mulf %14, %6 : vector<16x32xf32>
    %cst_6 = arith.constant 9.99999997E-7 : f32
    %16 = vector.broadcast %cst_6 : f32 to vector<16x1xf32>
    %17 = arith.addf %12, %16 : vector<16x1xf32>
    %18 = vector.broadcast %17 : vector<16x1xf32> to vector<16x32xf32>
    %19 = arith.divf %15, %18 : vector<16x32xf32>
    %c0_7 = arith.constant 0 : index
    %c0_8 = arith.constant 0 : index
    %20 = vector.load %arg3[%c0_7, %c0_8] : memref<1x32xf32, #tpu.memory_space<vmem>>, vector<1x32xf32>
    %21 = vector.broadcast %20 : vector<1x32xf32> to vector<16x32xf32>
    %22 = arith.addf %19, %21 : vector<16x32xf32>
    %c0_9 = arith.constant 0 : index
    %c0_10 = arith.constant 0 : index
    %23 = vector.load %arg4[%c0_9, %c0_10] : memref<16x32xf32, #tpu.memory_space<vmem>>, vector<16x32xf32>
    tpu.vector_store %arg4[%c0_9, %c0_10], %22 {strides = array<i32>} : memref<16x32xf32, #tpu.memory_space<vmem>>, vector<16x32xf32>,
    return
  }
  func.func @transform_0(%arg0: i32) -> (i32, i32) {
    %c0_i32 = arith.constant 0 : i32
    %c0_i32_0 = arith.constant 0 : i32
    return %arg0, %c0_i32 : i32, i32
  }
  func.func @transform_1(%arg0: i32) -> (i32, i32) {
    %c0_i32 = arith.constant 0 : i32
    %c0_i32_0 = arith.constant 0 : i32
    %c0_i32_1 = arith.constant 0 : i32
    return %c0_i32, %c0_i32_0 : i32, i32
  }
  func.func @transform_2(%arg0: i32) -> (i32, i32) {
    %c0_i32 = arith.constant 0 : i32
    %c0_i32_0 = arith.constant 0 : i32
    %c0_i32_1 = arith.constant 0 : i32
    return %c0_i32, %c0_i32_0 : i32, i32
  }
  func.func @transform_3(%arg0: i32) -> (i32, i32) {
    %c0_i32 = arith.constant 0 : i32
    %c0_i32_0 = arith.constant 0 : i32
    return %arg0, %c0_i32 : i32, i32
  }
}

</mosaic_0001>

<bundles_post_ra>
// kernel: tpu_custom_call.1
= control target key start
LH: loop header
LB: loop body
LE: loop exit
PB: predicated region body
PF: predicated region fallthrough
CT: control target
= control target key end

     0   :  { %8 = vsyncpa [#allocation3], 0  ;;  %s216_s0 = inlined_call_operand.hbm [shape: f32[16,32], index: 0, kind: input, shape index: {}]   ;;  %s217_s1 = inlined_call_operand.vmem [shape: f32[1,32], index: 1, kind: input, shape index: {}]   ;;  %s218_s2 = inlined_call_operand.vmem [shape: f32[1,32], index: 2, kind: input, shape index: {}]   ;;  %s219_s3 = inlined_call_operand.hbm [shape: f32[16,32], index: 3, kind: output, shape index: {}]  }
   0x1   :  { %9 = vsyncpa [#allocation4], 0  ;;  %s168_s12 = smov [#allocation2]  }
   0x2   :  { %s15_s13 = sshll.u32 %s168_s12, 4  ;;  %s16_s13 = int_to_ptr.vmem [resolvable:$true] %s15_s13 }
   0x3   :  { %s132_s14 = scalar_lea.vmem %s16_s13, 256  ;;  %p137_p1 = scmp.lt.s32.totalorder %s16_s13, %s16_s13 }
   0x4   :  { %p133_p0 = scmp.ne.s32.totalorder %s16_s13, %s132_s14  ;;  %p138_p2 = scmp.lt.s32.totalorder %s132_s14, %s132_s14 }
   0x6   :  { %p139_p3 = por %p138_p2, %p137_p1 }
   0x8   :  { %p140_p4 = pnand %p139_p3, %p133_p0 }
   0xa   :  { %143 = shalt.err (!%p140_p4)
}
   0xb   :  { %s169_s15 = smov 128   ;;  %s170_s16 = smov 8  }
   0xc   :  { %21 = dma.hbm_to_vmem [thread:$0]  %s216_s0, 256, %s16_s13, [#allocation3], %s169_s15, %s169_s15, %s170_s16  }
   0xd   :  { %164 = dma.done.wait [#allocation3], 256  }
   0xe   :  { %165 = vsyncadd [#allocation3], 4294967040  ;;  %vm31_vm0 = vcmask 261120   ;;  %v29_v0 = vld [vmem:[#allocation2] sm:$0xff]  ;;  %v30_v1 = vld [vmem:[#allocation2 + $0x8] sm:$0xff]  ;;  %s171_s22 = smov [#allocation5]  }
   0xf   :  { %v32_v2 = vsel %vm31_vm0, %v29_v0, 0.0  ;;  %v35_v3 = vsel %vm31_vm0, %v30_v1, 0.0  ;;  %v110_v30 = vld [vmem:[%s217_s1] ss:$0 sm:$0xff]  ;;  %s98_s23 = sshll.u32 %s171_s22, 4  ;;  %s99_s23 = int_to_ptr.vmem [resolvable:$true] %s98_s23 }
  0x10   :  { %33 = vadd.xlane.f32.xlu0 %v32_v2  ;;  %v111_v33 = vld [vmem:[%s218_s2] ss:$0 sm:$0xff]  ;;  %s144_s1 = scalar_lea.vmem %s99_s23, 256  ;;  %p149_p6 = scmp.lt.s32.totalorder %s99_s23, %s99_s23 }
  0x11   :  { %p145_p5 = scmp.ne.s32.totalorder %s99_s23, %s144_s1  ;;  %p150_p7 = scmp.lt.s32.totalorder %s144_s1, %s144_s1 }
  0x13   :  { %p151_p8 = por %p150_p7, %p149_p6 }
  0x14   :  { %36 = vadd.xlane.f32.xlu0 %v35_v3 }
  0x15   :  { %p152_p9 = pnand %p151_p8, %p145_p5 }
  0x99   :  { %v34_v4 = vpop.xlane.xlu0 %33 }
  0x9a   :  { %v39_v5 = vmul.f32 0.03125, %v34_v4 }
  0x9c   :  { %v41_v6 = vsub.f32 %v29_v0, %v39_v5 }
  0x9d   :  { %v37_v7 = vpop.xlane.xlu0 %36 }
  0x9e   :  { %v40_v8 = vmul.f32 0.03125, %v37_v7  ;;  %v43_v9 = vmul.f32 %v41_v6, %v41_v6  ;;  %v74_v31 = vmul.f32 %v110_v30, %v41_v6 }
  0xa0   :  { %v42_v10 = vsub.f32 %v30_v1, %v40_v8  ;;  %v45_v11 = vsel %vm31_vm0, %v43_v9, 0.0 }
  0xa1   :  { %46 = vadd.xlane.f32.xlu1 %v45_v11 }
  0xa2   :  { %v44_v12 = vmul.f32 %v42_v10, %v42_v10  ;;  %v75_v35 = vmul.f32 %v110_v30, %v42_v10 }
  0xa4   :  { %v48_v13 = vsel %vm31_vm0, %v44_v12, 0.0 }
  0xa5   :  { %49 = vadd.xlane.f32.xlu1 %v48_v13 }
 0x12a   :  { %v47_v14 = vpop.xlane.xlu1 %46 }
 0x12b   :  { %v51_v15 = vmul.f32 0.032258064, %v47_v14 }
 0x12d   :  { %116 = vrsqrt.f32 %v51_v15  ;;  %vm55_vm1 = vcmp.eq.f32.partialorder %v51_v15, inf  ;;  %v58_v20 = vand.u32 2147483648, %v51_v15  ;;  %vm57_vm2 = vcmp.eq.f32.partialorder %v51_v15, 0.0 }
 0x12e   :  { %v50_v16 = vpop.xlane.xlu1 %49 }
 0x12f   :  { %v52_v17 = vmul.f32 0.032258064, %v50_v16 }
 0x131   :  { %118 = vrsqrt.f32 %v52_v17  ;;  %vm62_vm3 = vcmp.eq.f32.partialorder %v52_v17, inf  ;;  %v65_v26 = vand.u32 2147483648, %v52_v17  ;;  %vm64_vm4 = vcmp.eq.f32.partialorder %v52_v17, 0.0 }
 0x13a   :  { %v117_v18 = vpop.eup %116 }
 0x13b   :  { %v54_v19 = vmul.f32 %v117_v18, %v51_v15 }
 0x13d   :  { %v56_v21 = vsel %vm55_vm1, %v51_v15, %v54_v19 }
 0x13e   :  { %v119_v22 = vpop.eup %118  ;;  %v59_v23 = vsel %vm57_vm2, %v58_v20, %v56_v21 }
 0x13f   :  { %v76_v24 = vadd.f32 1e-06, %v59_v23  ;;  %v61_v25 = vmul.f32 %v119_v22, %v52_v17 }
 0x141   :  { %120 = vrcp.f32 %v76_v24  ;;  %v63_v27 = vsel %vm62_vm3, %v52_v17, %v61_v25 }
 0x142   :  { %v66_v28 = vsel %vm64_vm4, %v65_v26, %v63_v27 }
 0x143   :  { %v77_v29 = vadd.f32 1e-06, %v66_v28 }
 0x145   :  { %122 = vrcp.f32 %v77_v29 }
 0x14e   :  { %v121_v32 = vpop.eup %120 }
 0x14f   :  { %v79_v34 = vmul.f32 %v121_v32, %v74_v31 }
 0x151   :  { %v89_v36 = vadd.f32 %v111_v33, %v79_v34 }
 0x152   :  { %v123_v37 = vpop.eup %122 }
 0x153   :  { %v81_v38 = vmul.f32 %v123_v37, %v75_v35  ;;  %91 = vst.msk [vmem:[#allocation5] sm:$0xff] %vm31_vm0, %v89_v36 }
 0x155   :  { %v90_v39 = vadd.f32 %v111_v33, %v81_v38 }
 0x157   :  { %92 = vst.msk [vmem:[#allocation5 + $0x8] sm:$0xff] %vm31_vm0, %v90_v39 }
 0x158   :  { %155 = shalt.err (!%p152_p9)
}
 0x159   :  { %104 = dma.vmem_to_hbm [thread:$0]  %s99_s23, 256, %s219_s3, [#allocation4], %s169_s15, %s169_s15, %s170_s16  }
 0x15a   :  { %166 = dma.done.wait [#allocation4], 256  }
 0x15b   :  { %167 = vsyncadd [#allocation4], 4294967040 }
 0x15c   :  { %108 = vsyncpa [#allocation3], 1 }
 0x15d   :  { %109 = vsyncpa [#allocation4], 1 }

</bundles_post_ra>
